<compile_context>
chip_gen: v6e
topology: v6e:2x2x1
jax: 0.10.0
libtpu: 0.0.40
codegen_flags: <defaults>
</compile_context>

<pallas_src>
import jax
import jax.numpy as jnp
from jax.experimental import pallas as pl
from jax.experimental.pallas import tpu as pltpu


def _make_divisible(v, divisor, min_value=None):
    if min_value is None:
        min_value = divisor
    new_v = max(min_value, int(v + divisor / 2) // divisor * divisor)
    if new_v < 0.9 * v:
        new_v += divisor
    return new_v


def _tpu_vmem_capacity_bytes():
    """Physical VMEM per TensorCore; falls back to 128 MiB (v5e/v6e) if the
    query is unavailable."""
    try:
        return int(pltpu.get_tpu_info().vmem_capacity_bytes)
    except Exception:
        return 128 * 1024 * 1024


def _make_se_kernel(channels_on_lanes, inv_hw, io_dtype):
    """Build the fused SE kernel for a given static layout / dtype.

    channels_on_lanes=False : x block is (bt, C, HW)   (HW on lanes)
    channels_on_lanes=True  : x block is (bt, HW, C)   (C  on lanes)
    """
    # For <32-bit inputs the pooled sum rides the MXU with exact f32
    # accumulation -> no f32 copy of the (bt, ., .) tile is materialised and
    # the lane/sublane reduction comes off the VPU/XLU.  f32 inputs keep the
    # plain reduction (no copy to avoid; bit-compatible with the reference).
    use_mxu_pool = jnp.dtype(io_dtype).itemsize < 4

    def kernel(x_ref, w1t_ref, b1_ref, w2t_ref, b2_ref, o_ref):
        x = x_ref[...]                                   # stays in I/O dtype

        # ---- squeeze: global average pool -> (bt, C) in f32 ----------------
        if channels_on_lanes:                            # x: (bt, HW, C)
            if use_mxu_pool:
                bt, hw, _ = x.shape
                ones = jnp.ones((bt, 1, hw), dtype=x.dtype)
                pooled = jnp.einsum('bkh,bhc->bkc', ones, x,
                                    preferred_element_type=jnp.float32)[:, 0, :]
            else:
                pooled = jnp.sum(x, axis=1, dtype=jnp.float32)
        else:                                            # x: (bt, C, HW)
            if use_mxu_pool:
                bt, _, hw = x.shape
                ones = jnp.ones((bt, 1, hw), dtype=x.dtype)
                pooled = jnp.einsum('bch,bkh->bck', x, ones,
                                    preferred_element_type=jnp.float32)[:, :, 0]
            else:
                pooled = jnp.sum(x, axis=-1, dtype=jnp.float32)
        pooled = pooled * inv_hw                         # (bt, C) f32

        # ---- excite: FC -> ReLU -> FC -> h_sigmoid (tiny, all f32) ---------
        h = jnp.dot(pooled, w1t_ref[...], preferred_element_type=jnp.float32)
        h = jnp.maximum(h + b1_ref[...], 0.0)            # (bt, hidden)
        y = jnp.dot(h, w2t_ref[...], preferred_element_type=jnp.float32)
        y = y + b2_ref[...]                              # (bt, C)
        y = jnp.clip(y + 3.0, 0.0, 6.0) * (1.0 / 6.0)    # h_sigmoid
        y = y.astype(o_ref.dtype)

        # ---- scale: big elementwise multiply in the I/O dtype ---------------
        if channels_on_lanes:
            o_ref[...] = x * y[:, None, :]
        else:
            o_ref[...] = x * y[:, :, None]

    return kernel


def _se_layer_impl(x, w1, b1, w2, b2):
    """SE block.  x: (B, C, H, W) NCHW.  Weights in PyTorch nn.Linear layout:
    w1 (hidden, C), b1 (1, hidden), w2 (C, hidden), b2 (1, C).
    Returns same shape/dtype as x.  NOTE: x is donated by the jitted wrapper;
    callers must not reuse x after the call."""
    B, C, H, W = x.shape
    HW = H * W
    hidden = w1.shape[0]
    itemsize = jnp.dtype(x.dtype).itemsize

    # ---- pick the lane-dense layout (biggest measured Pallas lever) --------
    pad8 = lambda n: -(-n // 8) * 8
    pad128 = lambda n: -(-n // 128) * 128
    chw_footprint = pad8(C) * pad128(HW)     # (bt, C, HW): HW on lanes
    hwc_footprint = pad8(HW) * pad128(C)     # (bt, HW, C): C  on lanes
    channels_on_lanes = hwc_footprint < chw_footprint

    if channels_on_lanes:
        # TODO(synk): in the full `encode` pipeline the surrounding conv stages
        # should hand us NHWC directly; here the PyTorch-facing layout is NCHW
        # so we transpose around the kernel.
        x_k = jnp.transpose(x, (0, 2, 3, 1)).reshape(B, HW, C)
        block_tail = (HW, C)
    else:
        x_k = x.reshape(B, C, HW)
        block_tail = (C, HW)

    # Weights pre-transposed once, outside the kernel (no in-kernel XLU work).
    w1t = jnp.transpose(w1)                   # (C, hidden)
    w2t = jnp.transpose(w2)                   # (hidden, C)
    w_bytes = 4 * (C * hidden + hidden + hidden * C + C)

    # ---- generation-aware block sizing / VMEM budget ------------------------
    vmem_cap = _tpu_vmem_capacity_bytes()
    small_vmem = vmem_cap <= 64 * 1024 * 1024            # v7x-class part
    vmem_ceiling = (48 if small_vmem else 96) * 1024 * 1024
    # 2x in + 2x out double-buffered x blocks + double-buffered weights must
    # fit under the ceiling with some compiler-scratch headroom.
    block_budget = max(2 * 1024 * 1024,
                       (vmem_ceiling - 2 * w_bytes - (2 << 20)) // 4)
    per_b = C * HW * itemsize
    cap = max(1, int(block_budget // max(per_b, 1)))
    if small_vmem and B >= 2:
        cap = min(cap, B // 2)     # keep >= 2 grid steps to feed both v7x TCs
    cap = max(1, min(cap, B))
    bt = max(d for d in range(1, cap + 1) if B % d == 0)

    grid = (B // bt,)
    block_bytes = bt * per_b
    vmem_limit = int(min(vmem_ceiling,
                         max(32 * 1024 * 1024,
                             4 * block_bytes + 2 * w_bytes + (4 << 20))))

    # Advisory: this call is memory-bound; let XLA schedule around it sensibly.
    cost = pl.CostEstimate(
        flops=2 * B * C * hidden * 2 + 3 * B * C * HW,
        transcendentals=0,
        bytes_accessed=2 * B * C * HW * itemsize + w_bytes)

    kernel = _make_se_kernel(channels_on_lanes, 1.0 / HW, x.dtype)

    out_k = pl.pallas_call(
        kernel,
        out_shape=jax.ShapeDtypeStruct(x_k.shape, x.dtype),
        grid_spec=pltpu.PrefetchScalarGridSpec(
            num_scalar_prefetch=0,
            grid=grid,
            in_specs=[
                pl.BlockSpec((bt,) + block_tail, lambda b: (b, 0, 0)),
                pl.BlockSpec((C, hidden), lambda b: (0, 0)),
                pl.BlockSpec((1, hidden), lambda b: (0, 0)),
                pl.BlockSpec((hidden, C), lambda b: (0, 0)),
                pl.BlockSpec((1, C), lambda b: (0, 0)),
            ],
            out_specs=pl.BlockSpec((bt,) + block_tail, lambda b: (b, 0, 0)),
        ),
        compiler_params=pltpu.CompilerParams(
            dimension_semantics=("parallel",),
            vmem_limit_bytes=vmem_limit),
        cost_estimate=cost,
        # Each x block is fully read before its output block is written and
        # shapes/dtypes match -> alias the output onto the input buffer.
        input_output_aliases={0: 0},
    )(x_k, w1t, b1, w2t, b2)

    if channels_on_lanes:
        return jnp.transpose(out_k.reshape(B, H, W, C), (0, 3, 1, 2))
    return out_k.reshape(B, C, H, W)


# Donate x so the input/output alias is honoured without a defensive copy
# (3x -> 2x HBM traffic on this memory-bound kernel).  Callers must treat x
# as consumed.
se_layer = jax.jit(_se_layer_impl, donate_argnums=0)


def se_layer_ref(x, w1, b1, w2, b2):
    """Pure-JAX reference matching the PyTorch SELayer forward."""
    pooled = jnp.mean(x.astype(jnp.float32), axis=(2, 3))              # (B, C)
    h = jnp.maximum(pooled @ w1.T + b1, 0.0)                            # (B, hidden)
    y = h @ w2.T + b2                                                   # (B, C)
    y = jnp.clip(y + 3.0, 0.0, 6.0) / 6.0
    return (x.astype(jnp.float32) * y[:, :, None, None]).astype(x.dtype)


def init_params(key, channel, reduction=4):
    """Deterministic init mimicking nn.Linear default (uniform +/- 1/sqrt(fan_in))."""
    hidden = _make_divisible(channel // reduction, 8)
    k1, k2, k3, k4 = jax.random.split(key, 4)
    bound1 = 1.0 / (channel ** 0.5)
    bound2 = 1.0 / (hidden ** 0.5)
    w1 = jax.random.uniform(k1, (hidden, channel), jnp.float32, -bound1, bound1)
    b1 = jax.random.uniform(k2, (1, hidden), jnp.float32, -bound1, bound1)
    w2 = jax.random.uniform(k3, (channel, hidden), jnp.float32, -bound2, bound2)
    b2 = jax.random.uniform(k4, (1, channel), jnp.float32, -bound2, bound2)
    return w1, b1, w2, b2


if __name__ == "__main__":
    import warnings
    warnings.filterwarnings("ignore", message="Some donated buffers were not usable")

    key = jax.random.PRNGKey(0)

    # Case 1 (required small shapes): f32, HW=256 lane-dense -> CHW layout.
    kx, kp, key = jax.random.split(key, 3)
    B, C, H, W = 2, 4, 16, 16
    x = jax.random.normal(kx, (B, C, H, W), jnp.float32)
    w1, b1, w2, b2 = init_params(kp, C, reduction=4)
    ref = se_layer_ref(x, w1, b1, w2, b2)
    out = jax.block_until_ready(se_layer(x, w1, b1, w2, b2))
    assert out.shape == (B, C, H, W)
    assert jnp.allclose(out, ref, atol=1e-5, rtol=1e-5), "case1 mismatch vs reference"

    # Case 2: late-MobileNet-like stage, bf16, 7x7 spatial -> C-on-lanes layout
    # + MXU pooling (bf16 rescale differs from the f32 reference by ~1 ulp).
    kx, kp, key = jax.random.split(key, 3)
    B, C, H, W = 2, 128, 7, 7
    x = jax.random.normal(kx, (B, C, H, W), jnp.float32).astype(jnp.bfloat16)
    w1, b1, w2, b2 = init_params(kp, C, reduction=4)
    ref = se_layer_ref(x, w1, b1, w2, b2)
    out = jax.block_until_ready(se_layer(x, w1, b1, w2, b2))
    assert out.shape == (B, C, H, W)
    assert jnp.allclose(out.astype(jnp.float32), ref.astype(jnp.float32),
                        atol=5e-2, rtol=5e-2), "case2 mismatch vs reference"

    # Case 3: bf16 with HW on lanes (exercises the CHW MXU-pool path).
    kx, kp, key = jax.random.split(key, 3)
    B, C, H, W = 4, 8, 16, 16
    x = jax.random.normal(kx, (B, C, H, W), jnp.float32).astype(jnp.bfloat16)
    w1, b1, w2, b2 = init_params(kp, C, reduction=4)
    ref = se_layer_ref(x, w1, b1, w2, b2)
    out = jax.block_until_ready(se_layer(x, w1, b1, w2, b2))
    assert out.shape == (B, C, H, W)
    assert jnp.allclose(out.astype(jnp.float32), ref.astype(jnp.float32),
                        atol=5e-2, rtol=5e-2), "case3 mismatch vs reference"

    print("KERNEL_OK")
</pallas_src>

<mosaic_0001>
module attributes {stable_mosaic.version = 11 : i64} {
  func.func @kernel(%arg0: i32, %arg1: memref<2x4x256xf32, #tpu.memory_space<vmem>>, %arg2: memref<4x8xf32, #tpu.memory_space<vmem>>, %arg3: memref<1x8xf32, #tpu.memory_space<vmem>>, %arg4: memref<8x4xf32, #tpu.memory_space<vmem>>, %arg5: memref<1x4xf32, #tpu.memory_space<vmem>>, %arg6: memref<2x4x256xf32, #tpu.memory_space<vmem>>) attributes {dimension_semantics = [#tpu.dimension_semantics<parallel>], iteration_bounds = array<i64: 1>, scalar_prefetch = 0 : i64, scratch_operands = 0 : i64, tpu.core_type = #tpu.core_type<tc>, window_params = [{transform_indices = @transform_0, window_bounds = array<i64: 2, 4, 256>}, {pipeline_mode = #tpu.pipeline_mode<synchronous>, transform_indices = @transform_1, window_bounds = array<i64: 4, 8>}, {pipeline_mode = #tpu.pipeline_mode<synchronous>, transform_indices = @transform_2, window_bounds = array<i64: 1, 8>}, {pipeline_mode = #tpu.pipeline_mode<synchronous>, transform_indices = @transform_3, window_bounds = array<i64: 8, 4>}, {pipeline_mode = #tpu.pipeline_mode<synchronous>, transform_indices = @transform_4, window_bounds = array<i64: 1, 4>}, {transform_indices = @transform_5, window_bounds = array<i64: 2, 4, 256>}]} {
    %c0 = arith.constant 0 : index
    %c0_0 = arith.constant 0 : index
    %c0_1 = arith.constant 0 : index
    %0 = vector.load %arg1[%c0, %c0_0, %c0_1] : memref<2x4x256xf32, #tpu.memory_space<vmem>>, vector<2x4x256xf32>
    %cst = arith.constant dense<0.000000e+00> : vector<2x4xf32>
    %1 = vector.multi_reduction <add>, %0, %cst [2] : vector<2x4x256xf32> to vector<2x4xf32>
    %cst_2 = arith.constant 3.906250e-03 : f32
    %2 = vector.broadcast %cst_2 : f32 to vector<2x4xf32>
    %3 = arith.mulf %1, %2 : vector<2x4xf32>
    %c0_3 = arith.constant 0 : index
    %c0_4 = arith.constant 0 : index
    %4 = vector.load %arg2[%c0_3, %c0_4] : memref<4x8xf32, #tpu.memory_space<vmem>>, vector<4x8xf32>
    %cst_5 = arith.constant dense<0.000000e+00> : vector<2x8xf32>
    %5 = tpu.matmul %3, %4, %cst_5 {dimension_numbers = #tpu.dot_dimension_numbers<[1], [0], [0], [1], [0, 0, 1, 1], [], []>} : vector<2x4xf32>, vector<4x8xf32>, vector<2x8xf32> -> vector<2x8xf32>
    %c0_6 = arith.constant 0 : index
    %c0_7 = arith.constant 0 : index
    %6 = vector.load %arg3[%c0_6, %c0_7] : memref<1x8xf32, #tpu.memory_space<vmem>>, vector<1x8xf32>
    %7 = vector.broadcast %6 : vector<1x8xf32> to vector<2x8xf32>
    %8 = arith.addf %5, %7 : vector<2x8xf32>
    %cst_8 = arith.constant 0.000000e+00 : f32
    %9 = vector.broadcast %cst_8 : f32 to vector<2x8xf32>
    %10 = arith.maximumf %8, %9 : vector<2x8xf32>
    %c0_9 = arith.constant 0 : index
    %c0_10 = arith.constant 0 : index
    %11 = vector.load %arg4[%c0_9, %c0_10] : memref<8x4xf32, #tpu.memory_space<vmem>>, vector<8x4xf32>
    %cst_11 = arith.constant dense<0.000000e+00> : vector<2x4xf32>
    %12 = tpu.matmul %10, %11, %cst_11 {dimension_numbers = #tpu.dot_dimension_numbers<[1], [0], [0], [1], [0, 0, 1, 1], [], []>} : vector<2x8xf32>, vector<8x4xf32>, vector<2x4xf32> -> vector<2x4xf32>
    %c0_12 = arith.constant 0 : index
    %c0_13 = arith.constant 0 : index
    %13 = vector.load %arg5[%c0_12, %c0_13] : memref<1x4xf32, #tpu.memory_space<vmem>>, vector<1x4xf32>
    %14 = vector.broadcast %13 : vector<1x4xf32> to vector<2x4xf32>
    %15 = arith.addf %12, %14 : vector<2x4xf32>
    %cst_14 = arith.constant 3.000000e+00 : f32
    %16 = vector.broadcast %cst_14 : f32 to vector<2x4xf32>
    %17 = arith.addf %15, %16 : vector<2x4xf32>
    %cst_15 = arith.constant 0.000000e+00 : f32
    %cst_16 = arith.constant 6.000000e+00 : f32
    %18 = vector.broadcast %cst_15 : f32 to vector<2x4xf32>
    %19 = arith.maximumf %18, %17 : vector<2x4xf32>
    %20 = vector.broadcast %cst_16 : f32 to vector<2x4xf32>
    %21 = arith.minimumf %20, %19 : vector<2x4xf32>
    %cst_17 = arith.constant 0.166666672 : f32
    %22 = vector.broadcast %cst_17 : f32 to vector<2x4xf32>
    %23 = arith.mulf %21, %22 : vector<2x4xf32>
    %24 = vector.shape_cast %23 : vector<2x4xf32> to vector<2x4x1xf32>
    %25 = vector.broadcast %24 : vector<2x4x1xf32> to vector<2x4x256xf32>
    %26 = arith.mulf %0, %25 : vector<2x4x256xf32>
    %c0_18 = arith.constant 0 : index
    %c0_19 = arith.constant 0 : index
    %c0_20 = arith.constant 0 : index
    %27 = vector.load %arg6[%c0_18, %c0_19, %c0_20] : memref<2x4x256xf32, #tpu.memory_space<vmem>>, vector<2x4x256xf32>
    tpu.vector_store %arg6[%c0_18, %c0_19, %c0_20], %26 {strides = array<i32>} : memref<2x4x256xf32, #tpu.memory_space<vmem>>, vector<2x4x256xf32>,
    return
  }
  func.func @transform_0(%arg0: i32) -> (i32, i32, i32) {
    %c0_i32 = arith.constant 0 : i32
    %c0_i32_0 = arith.constant 0 : i32
    %c0_i32_1 = arith.constant 0 : i32
    return %arg0, %c0_i32, %c0_i32_0 : i32, i32, i32
  }
  func.func @transform_1(%arg0: i32) -> (i32, i32) {
    %c0_i32 = arith.constant 0 : i32
    %c0_i32_0 = arith.constant 0 : i32
    %c0_i32_1 = arith.constant 0 : i32
    return %c0_i32, %c0_i32_0 : i32, i32
  }
  func.func @transform_2(%arg0: i32) -> (i32, i32) {
    %c0_i32 = arith.constant 0 : i32
    %c0_i32_0 = arith.constant 0 : i32
    %c0_i32_1 = arith.constant 0 : i32
    return %c0_i32, %c0_i32_0 : i32, i32
  }
  func.func @transform_3(%arg0: i32) -> (i32, i32) {
    %c0_i32 = arith.constant 0 : i32
    %c0_i32_0 = arith.constant 0 : i32
    %c0_i32_1 = arith.constant 0 : i32
    return %c0_i32, %c0_i32_0 : i32, i32
  }
  func.func @transform_4(%arg0: i32) -> (i32, i32) {
    %c0_i32 = arith.constant 0 : i32
    %c0_i32_0 = arith.constant 0 : i32
    %c0_i32_1 = arith.constant 0 : i32
    return %c0_i32, %c0_i32_0 : i32, i32
  }
  func.func @transform_5(%arg0: i32) -> (i32, i32, i32) {
    %c0_i32 = arith.constant 0 : i32
    %c0_i32_0 = arith.constant 0 : i32
    %c0_i32_1 = arith.constant 0 : i32
    return %arg0, %c0_i32, %c0_i32_0 : i32, i32, i32
  }
}

</mosaic_0001>

<bundles_post_ra>
// kernel: _se_layer_impl.1
= control target key start
LH: loop header
LB: loop body
LE: loop exit
PB: predicated region body
PF: predicated region fallthrough
CT: control target
= control target key end

     0   :  { %vm28_vm0 = vcmask 1043456   ;;  %v290_v10 = vmov 0.0   ;;  %vm291_vm1 = vmmov 0   ;;  %v51_v12 = vlaneseq  ;;  %s364_s0 = inlined_call_operand.vmem [shape: f32[2,4,256], index: 0, kind: input, shape index: {}, may-alias: {0,5}]   ;;  %s365_s1 = inlined_call_operand.vmem [shape: f32[4,8], index: 1, kind: input, shape index: {}]   ;;  %s366_s3 = inlined_call_operand.vmem [shape: f32[8,4], index: 3, kind: input, shape index: {}]   ;;  %s367_s2 = inlined_call_operand.vmem [shape: f32[1,8], index: 2, kind: input, shape index: {}]   ;;  %s368_s4 = inlined_call_operand.vmem [shape: f32[1,4], index: 4, kind: input, shape index: {}]   ;;  %s369_s5 = inlined_call_operand.vmem [shape: f32[2,4,256], index: 5, kind: output, shape index: {}, may-alias: {0,5}]  }
   0x1   :  { %v326_v0 = vld [vmem:[%s364_s0] sm:$0xff]  ;;  %v331_v1 = vld [vmem:[%s364_s0 + $0x8] sm:$0xff]  ;;  %275 = vmatprep.subr.mxu0 %v290_v10  ;;  %277 = vmatprep.mubr.msk.f32.mxu0 %vm291_vm1, %v290_v10  ;;  %vm61_vm2 = vcmask 1041409   ;;  %vm63_vm3 = vcmask 31744   ;;  %vm148_vm4 = vcmask 64512  }
   0x2   :  { %v24_v2 = vcombine.high %v326_v0, %v326_v0  ;;  %v29_v3 = vsel %vm28_vm0, %v326_v0, 0.0  ;;  %v25_v4 = vcombine.high %v331_v1, %v331_v1  ;;  %v34_v6 = vsel %vm28_vm0, %v331_v1, 0.0  ;;  %v41_v11 = vld [vmem:[%s365_s1] sm:$0xf]  ;;  %280 = vmatprep.subr.mxu1 %v290_v10  ;;  %282 = vmatprep.mubr.msk.f32.mxu1 %vm291_vm1, %v290_v10 }
   0x3   :  { %276 = vmatpush3.msk.msra.mxu0 %vm28_vm0, %v41_v11  ;;  %v52_v13 = vand.u32 127, %v51_v12  ;;  %v54_v14 = vshrl.u32 %v51_v12, 7  ;;  %v140_v23 = vld [vmem:[%s366_s3] sm:$0xff]  ;;  %v292_v41 = vmov 839922192  }
   0x4   :  { %v30_v5 = vsel %vm28_vm0, %v24_v2, 0.0  ;;  %v35_v7 = vsel %vm28_vm0, %v25_v4, 0.0  ;;  %281 = vmatpush3.msra.mxu1 %v140_v23  ;;  %v266_v24 = vld [vmem:[%s367_s2] ss:$0 sm:$0xff]  ;;  %v243_v42 = vunpack.c.l.s4 %v292_v41 }
   0x5   :  { %v31_v8 = vadd.f32 %v30_v5, %v29_v3  ;;  %v36_v9 = vadd.f32 %v35_v7, %v34_v6  ;;  %v55_v16 = vsub.s32 %v52_v13, %v54_v14  ;;  %v269_v29 = vld [vmem:[%s368_s4] ss:$0 sm:$0xff]  ;;  %v228_v36 = vsub.s32 0, %v54_v14 }
   0x6   :  { %v235_v39 = vsub.s32 1, %v54_v14  ;;  %v244_v43 = vunpack.c.0.s8 %v243_v42 }
   0x7   :  { %32 = vadd.xlane.f32.xlu0 %v31_v8 }
   0x8   :  { %v247_v44 = vsub.s32 %v244_v43, %v54_v14 }
   0xb   :  { %37 = vadd.xlane.f32.xlu0 %v36_v9 }
  0x90   :  { %v33_v15 = vpop.xlane.xlu0 %32 }
  0x91   :  { %v39_v17 = vmul.f32 0.00390625, %v33_v15 }
  0x93   :  { %v56_v20 = vrot.slane %v39_v17, %v55_v16 }
  0x94   :  { %v38_v18 = vpop.xlane.xlu0 %37 }
  0x95   :  { %v40_v19 = vmul.f32 0.00390625, %v38_v18 }
  0x97   :  { %v60_v21 = vrot.slane %v40_v19, %v55_v16 }
  0x99   :  { %v62_v22 = vsel %vm61_vm2, %v60_v21, %v56_v20 }
  0x9a   :  { %278 = vmatmul.mubr.msk.f32.vlgmr.msra.gmra.mxu0 %vm63_vm3, %v62_v22 }
 0x15a   :  { %v135_v25 = vpop.f32.mrf.mxu0 }
 0x15b   :  { %v136_v26 = vadd.f32 %v266_v24, %v135_v25 }
 0x15c   :  { %v279_v27 = vpop.f32.mrf.mxu0 }
 0x15d   :  { %v139_v28 = vmax.f32 %v136_v26, 0.0 }
 0x15f   :  { %283 = vmatmul.mubr.msk.f32.vlgmr.msra.gmra.mxu1 %vm148_vm4, %v139_v28 }
 0x21f   :  { %v218_v30 = vpop.f32.mrf.mxu1 }
 0x220   :  { %v219_v31 = vadd.f32 %v269_v29, %v218_v30 }
 0x221   :  { %v284_v32 = vpop.f32.mrf.mxu1 }
 0x222   :  { %v222_v33 = vadd.f32 3.0, %v219_v31 }
 0x224   :  { %v223_v34 = vmax.f32 %v222_v33, 0.0 }
 0x226   :  { %v224_v35 = vmin.f32 %v223_v34, 6.0 }
 0x228   :  { %v225_v37 = vmul.f32 0.16666667, %v224_v35 }
 0x22a   :  { %v229_v38 = vrot.slane %v225_v37, %v228_v36  ;;  %v236_v40 = vrot.slane %v225_v37, %v235_v39 }
 0x22c   :  { %231 = vbcast.lane.b32.xlu1 %v229_v38, 256 }
 0x230   :  { %238 = vbcast.lane.b32.xlu1 %v236_v40, 256 }
 0x29e   :  { %v232_v45 = vpop.permute.xlu1 %231 }
 0x29f   :  { %v248_v46 = vrot.slane %v232_v45, %v247_v44 }
 0x2a1   :  { %v258_v47 = vmul.f32 %v248_v46, %v326_v0 }
 0x2a2   :  { %v239_v48 = vpop.permute.xlu1 %238 }
 0x2a3   :  { %260 = vst [vmem:[%s369_s5] sm:$0xff] %v258_v47  ;;  %v255_v49 = vrot.slane %v239_v48, %v247_v44 }
 0x2a5   :  { %v259_v50 = vmul.f32 %v255_v49, %v331_v1 }
 0x2a7   :  { %261 = vst [vmem:[%s369_s5 + $0x8] sm:$0xff] %v259_v50 }

</bundles_post_ra>
